<compile_context>
chip_gen: v5e
topology: v5e:2x2
jax: 0.10.0
libtpu: 0.0.40
codegen_flags: <defaults>
</compile_context>

<pallas_src>
import functools

import jax
import jax.numpy as jnp
from jax.experimental import pallas as pl
from jax.experimental.pallas import tpu as pltpu


# ---------------------------------------------------------------------------
# Pass 1: fused Q/K/V input projections (hoisted, full-width MXU matmuls)
# ---------------------------------------------------------------------------
def _qkv_proj_kernel(q_ref, k_ref, v_ref,
                     wq_ref, wk_ref, wv_ref,
                     bq_ref, bk_ref, bv_ref,
                     qo_ref, ko_ref, vo_ref):
    # bf16 operands on the MXU, f32 accumulation + bias, bf16 store.
    qo_ref[...] = (jnp.dot(q_ref[...], wq_ref[...],
                           preferred_element_type=jnp.float32)
                   + bq_ref[...]).astype(qo_ref.dtype)
    ko_ref[...] = (jnp.dot(k_ref[...], wk_ref[...],
                           preferred_element_type=jnp.float32)
                   + bk_ref[...]).astype(ko_ref.dtype)
    vo_ref[...] = (jnp.dot(v_ref[...], wv_ref[...],
                           preferred_element_type=jnp.float32)
                   + bv_ref[...]).astype(vo_ref.dtype)


# ---------------------------------------------------------------------------
# Pass 2: attention + output projection, hp heads per grid step
# ---------------------------------------------------------------------------
def _attn_kernel(qp_ref, kp_ref, vp_ref, bias_ref, wo_ref, bo_ref,
                 out_ref, acc_ref, *, heads_per_block, head_dim):
    hb = pl.program_id(2)

    @pl.when(hb == 0)
    def _init():
        acc_ref[...] = jnp.zeros_like(acc_ref)

    ctx_parts = []
    for hh in range(heads_per_block):            # static Python loop, hp small
        sl = pl.ds(hh * head_dim, head_dim)
        qh = qp_ref[:, sl]                       # (tq, d) bf16 (scale folded)
        kh = kp_ref[:, sl]                       # (S,  d) bf16
        vh = vp_ref[:, sl]                       # (S,  d) bf16

        # scores = qh @ kh^T as a last-dim contraction (no explicit transpose).
        scores = jax.lax.dot_general(
            qh, kh, dimension_numbers=(((1,), (1,)), ((), ())),
            preferred_element_type=jnp.float32)                   # (tq, S)
        scores = scores + bias_ref[hh].astype(jnp.float32)

        # Numerically-stable softmax in f32; reciprocal on the EUP slot.
        m = jnp.max(scores, axis=-1, keepdims=True)
        e = jnp.exp(scores - m)
        denom = jnp.maximum(jnp.sum(e, axis=-1, keepdims=True), 1e-30)
        probs = (e * pl.reciprocal(denom, approx=True)).astype(jnp.bfloat16)
        # TODO(synk): attention dropout is identity in eval mode; not modeled.

        ctx_parts.append(jnp.dot(probs, vh,
                                 preferred_element_type=jnp.float32))  # (tq, d)

    # (tq, hp*d): small lane concat so the output projection contracts over
    # hp*d (>= 128 lanes) instead of a single narrow head_dim.
    ctx = jnp.concatenate(ctx_parts, axis=-1).astype(jnp.bfloat16)
    acc_ref[...] += jnp.dot(ctx, wo_ref[...],
                            preferred_element_type=jnp.float32)        # (tq, H)

    @pl.when(hb == pl.num_programs(2) - 1)
    def _finalize():
        out_ref[...] = (acc_ref[...] + bo_ref[...]).astype(out_ref.dtype)


# ---------------------------------------------------------------------------
# Host-side helpers
# ---------------------------------------------------------------------------
def _pick_q_tile(seq_len):
    # Never fall back to a whole-sequence tile for long sequences (that would
    # give an (S, S) scores/bias block); pad S to a multiple of 128 instead.
    return seq_len if seq_len <= 128 else 128


def _pick_heads_per_block(num_heads, head_dim, target_width=256):
    # hp*head_dim must be a multiple of 128 (lane width / BlockSpec rule) or
    # cover all heads.  Prefer the smallest hp reaching ~256 lanes to fill the
    # 256-wide v6e/v7x MXU without over-growing per-step VMEM (on v5e the extra
    # width simply becomes two MXU passes — still fully utilized).
    legal = [hp for hp in range(1, num_heads + 1)
             if num_heads % hp == 0
             and ((hp * head_dim) % 128 == 0 or hp == num_heads)]
    for hp in legal:
        if hp * head_dim >= target_width:
            return hp
    return legal[-1]


def _vmem_limit_bytes():
    # Generation-aware VMEM budget (v5e/v6e: 128 MiB, v7x: 64 MiB per core).
    try:
        cap = pltpu.get_tpu_info().vmem_capacity_bytes
    except Exception:
        cap = 128 * 1024 * 1024
    return int(max(32 * 1024 * 1024,
                   min(cap - 16 * 1024 * 1024, 96 * 1024 * 1024)))


# ---------------------------------------------------------------------------
# Wrapper
# ---------------------------------------------------------------------------
def multi_head_attention(q, k, v, params, attn_bias, *, num_heads):
    """Forward of the PyTorch MultiHeadAttention module (eval mode).

    q, k, v:   [B, S, H] float32
    attn_bias: [B, num_heads, S, S] float32
    params:    (wq, bq, wk, bk, wv, bv, wo, bo), weights stored as [in, out].
    """
    B, S, H = q.shape
    d = H // num_heads
    scale = d ** (-0.5)
    wq, bq, wk, bk, wv, bv, wo, bo = params
    out_dtype = q.dtype
    vmem_limit = _vmem_limit_bytes()

    # ---- one-time host-side prep -------------------------------------------
    # Fold the query scale into wq/bq; bf16 weights & activations, f32 biases.
    wq_p = (wq * scale).astype(jnp.bfloat16)
    wk_p = wk.astype(jnp.bfloat16)
    wv_p = wv.astype(jnp.bfloat16)
    wo_p = wo.astype(jnp.bfloat16)
    bq_p = (bq * scale).reshape(1, H).astype(jnp.float32)
    bk_p = bk.reshape(1, H).astype(jnp.float32)
    bv_p = bv.reshape(1, H).astype(jnp.float32)
    bo_p = bo.reshape(1, H).astype(jnp.float32)

    q16 = q.astype(jnp.bfloat16)
    k16 = k.astype(jnp.bfloat16)
    v16 = v.astype(jnp.bfloat16)
    bias16 = attn_bias.astype(jnp.bfloat16)

    # Pad the sequence to a multiple of the query tile; padded keys get a large
    # negative bias so they receive zero attention weight.
    tq = _pick_q_tile(S)
    S_pad = ((S + tq - 1) // tq) * tq
    if S_pad != S:
        pad = S_pad - S
        q16 = jnp.pad(q16, ((0, 0), (0, pad), (0, 0)))
        k16 = jnp.pad(k16, ((0, 0), (0, pad), (0, 0)))
        v16 = jnp.pad(v16, ((0, 0), (0, pad), (0, 0)))
        bias16 = jnp.pad(bias16, ((0, 0), (0, 0), (0, pad), (0, pad)),
                         constant_values=-1e9)
    n_q = S_pad // tq

    # ---- pass 1: hoisted Q/K/V projections ----------------------------------
    row_spec = pl.BlockSpec((None, tq, H), lambda b, i: (b, i, 0))
    w_spec = pl.BlockSpec((H, H), lambda b, i: (0, 0))      # resident weights
    b_spec = pl.BlockSpec((1, H), lambda b, i: (0, 0))
    proj_shape = jax.ShapeDtypeStruct((B, S_pad, H), jnp.bfloat16)

    qp, kp, vp = pl.pallas_call(
        _qkv_proj_kernel,
        out_shape=(proj_shape, proj_shape, proj_shape),
        grid_spec=pltpu.PrefetchScalarGridSpec(
            num_scalar_prefetch=0,
            grid=(B, n_q),
            in_specs=[row_spec, row_spec, row_spec,
                      w_spec, w_spec, w_spec,
                      b_spec, b_spec, b_spec],
            out_specs=[row_spec, row_spec, row_spec]),
        compiler_params=pltpu.CompilerParams(
            dimension_semantics=("parallel", "parallel"),
            vmem_limit_bytes=vmem_limit),
    )(q16, k16, v16, wq_p, wk_p, wv_p, bq_p, bk_p, bv_p)

    # ---- pass 2: attention + output projection ------------------------------
    hp = _pick_heads_per_block(num_heads, d)
    n_hb = num_heads // hp
    hw = hp * d                        # lane width handled per grid step

    q_spec = pl.BlockSpec((None, tq, hw), lambda b, i, h: (b, i, h))
    kv_spec = pl.BlockSpec((None, S_pad, hw), lambda b, i, h: (b, 0, h))
    # (optionally pipeline_mode=pl.Buffered(3) on bias if profiles show an
    #  exposed per-step DMA wait)
    bias_spec = pl.BlockSpec((None, hp, tq, S_pad), lambda b, i, h: (b, h, i, 0))
    wo_spec = pl.BlockSpec((hw, H), lambda b, i, h: (h, 0))
    bo_spec = pl.BlockSpec((1, H), lambda b, i, h: (0, 0))
    out_spec = pl.BlockSpec((None, tq, H), lambda b, i, h: (b, i, 0))

    out = pl.pallas_call(
        functools.partial(_attn_kernel, heads_per_block=hp, head_dim=d),
        out_shape=jax.ShapeDtypeStruct((B, S_pad, H), out_dtype),
        grid_spec=pltpu.PrefetchScalarGridSpec(
            num_scalar_prefetch=0,
            grid=(B, n_q, n_hb),
            in_specs=[q_spec, kv_spec, kv_spec, bias_spec, wo_spec, bo_spec],
            out_specs=out_spec,
            scratch_shapes=[pltpu.VMEM((tq, H), jnp.float32)]),
        compiler_params=pltpu.CompilerParams(
            # batch & query-tile axes independent (megacore shardable); the
            # head-block axis is a reduction into the output accumulator.
            dimension_semantics=("parallel", "parallel", "arbitrary"),
            vmem_limit_bytes=vmem_limit),
    )(qp, kp, vp, bias16, wo_p, bo_p)

    if S_pad != S:
        out = out[:, :S, :]
    return out


# ---------------------------------------------------------------------------
# Pure-JAX reference (mirrors the PyTorch forward, full f32)
# ---------------------------------------------------------------------------
def reference_mha(q, k, v, params, attn_bias, *, num_heads):
    B, S, H = q.shape
    d = H // num_heads
    scale = d ** (-0.5)
    wq, bq, wk, bk, wv, bv, wo, bo = params

    Q = (q @ wq + bq).reshape(B, S, num_heads, d).transpose(0, 2, 1, 3)
    K = (k @ wk + bk).reshape(B, S, num_heads, d).transpose(0, 2, 1, 3)
    V = (v @ wv + bv).reshape(B, S, num_heads, d).transpose(0, 2, 1, 3)

    scores = jnp.einsum('bhqd,bhkd->bhqk', Q * scale, K) + attn_bias
    attn = jax.nn.softmax(scores, axis=-1)
    ctx = jnp.einsum('bhqk,bhkd->bhqd', attn, V)
    ctx = ctx.transpose(0, 2, 1, 3).reshape(B, S, H)
    return ctx @ wo + bo


# ---------------------------------------------------------------------------
if __name__ == "__main__":
    B, S, H, NH = 2, 8, 32, 4           # batch, seq, hidden, num_heads
    key = jax.random.PRNGKey(0)
    ks = jax.random.split(key, 16)

    bound = 1.0 / (H ** 0.5)
    def u(kk, shape):
        return jax.random.uniform(kk, shape, jnp.float32, -bound, bound)

    # Weights stored as [in, out] (PyTorch Linear weight transposed).
    wq, bq = u(ks[0], (H, H)), u(ks[1], (H,))
    wk, bk = u(ks[2], (H, H)), u(ks[3], (H,))
    wv, bv = u(ks[4], (H, H)), u(ks[5], (H,))
    wo, bo = u(ks[6], (H, H)), u(ks[7], (H,))
    params = (wq, bq, wk, bk, wv, bv, wo, bo)

    q = jax.random.normal(ks[8], (B, S, H), jnp.float32)
    k = jax.random.normal(ks[9], (B, S, H), jnp.float32)
    v = jax.random.normal(ks[10], (B, S, H), jnp.float32)
    attn_bias = 0.1 * jax.random.normal(ks[11], (B, NH, S, S), jnp.float32)

    out = multi_head_attention(q, k, v, params, attn_bias, num_heads=NH)
    out = jax.block_until_ready(out)

    ref = reference_mha(q, k, v, params, attn_bias, num_heads=NH)
    assert out.shape == (B, S, H)
    # bf16 MXU operands / bf16 bias with f32 accumulation -> loosened tolerance.
    assert jnp.allclose(out, ref, atol=5e-2, rtol=5e-2), \
        f"max err {jnp.max(jnp.abs(out - ref))}"

    print("KERNEL_OK")
</pallas_src>

<mosaic_0001>
module attributes {stable_mosaic.version = 11 : i64} {
  func.func @_qkv_proj_kernel(%arg0: i32, %arg1: i32, %arg2: memref<1x8x32xbf16, #tpu.memory_space<vmem>>, %arg3: memref<1x8x32xbf16, #tpu.memory_space<vmem>>, %arg4: memref<1x8x32xbf16, #tpu.memory_space<vmem>>, %arg5: memref<32x32xbf16, #tpu.memory_space<vmem>>, %arg6: memref<32x32xbf16, #tpu.memory_space<vmem>>, %arg7: memref<32x32xbf16, #tpu.memory_space<vmem>>, %arg8: memref<1x32xf32, #tpu.memory_space<vmem>>, %arg9: memref<1x32xf32, #tpu.memory_space<vmem>>, %arg10: memref<1x32xf32, #tpu.memory_space<vmem>>, %arg11: memref<1x8x32xbf16, #tpu.memory_space<vmem>>, %arg12: memref<1x8x32xbf16, #tpu.memory_space<vmem>>, %arg13: memref<1x8x32xbf16, #tpu.memory_space<vmem>>) attributes {dimension_semantics = [#tpu.dimension_semantics<parallel>, #tpu.dimension_semantics<parallel>], iteration_bounds = array<i64: 2, 1>, scalar_prefetch = 0 : i64, scratch_operands = 0 : i64, tpu.core_type = #tpu.core_type<tc>, window_params = [{transform_indices = @transform_0, window_bounds = array<i64: 1, 8, 32>}, {transform_indices = @transform_1, window_bounds = array<i64: 1, 8, 32>}, {transform_indices = @transform_2, window_bounds = array<i64: 1, 8, 32>}, {pipeline_mode = #tpu.pipeline_mode<synchronous>, transform_indices = @transform_3, window_bounds = array<i64: 32, 32>}, {pipeline_mode = #tpu.pipeline_mode<synchronous>, transform_indices = @transform_4, window_bounds = array<i64: 32, 32>}, {pipeline_mode = #tpu.pipeline_mode<synchronous>, transform_indices = @transform_5, window_bounds = array<i64: 32, 32>}, {pipeline_mode = #tpu.pipeline_mode<synchronous>, transform_indices = @transform_6, window_bounds = array<i64: 1, 32>}, {pipeline_mode = #tpu.pipeline_mode<synchronous>, transform_indices = @transform_7, window_bounds = array<i64: 1, 32>}, {pipeline_mode = #tpu.pipeline_mode<synchronous>, transform_indices = @transform_8, window_bounds = array<i64: 1, 32>}, {transform_indices = @transform_9, window_bounds = array<i64: 1, 8, 32>}, {transform_indices = @transform_10, window_bounds = array<i64: 1, 8, 32>}, {transform_indices = @transform_11, window_bounds = array<i64: 1, 8, 32>}]} {
    %c0 = arith.constant 0 : index
    %c0_0 = arith.constant 0 : index
    %c0_1 = arith.constant 0 : index
    %0 = vector.load %arg2[%c0, %c0_0, %c0_1] : memref<1x8x32xbf16, #tpu.memory_space<vmem>>, vector<1x8x32xbf16>
    %1 = vector.shape_cast %0 : vector<1x8x32xbf16> to vector<8x32xbf16>
    %c0_2 = arith.constant 0 : index
    %c0_3 = arith.constant 0 : index
    %2 = vector.load %arg5[%c0_2, %c0_3] : memref<32x32xbf16, #tpu.memory_space<vmem>>, vector<32x32xbf16>
    %cst = arith.constant dense<0.000000e+00> : vector<8x32xf32>
    %3 = tpu.matmul %1, %2, %cst {dimension_numbers = #tpu.dot_dimension_numbers<[1], [0], [0], [1], [0, 0, 1, 1], [], []>} : vector<8x32xbf16>, vector<32x32xbf16>, vector<8x32xf32> -> vector<8x32xf32>
    %c0_4 = arith.constant 0 : index
    %c0_5 = arith.constant 0 : index
    %4 = vector.load %arg8[%c0_4, %c0_5] : memref<1x32xf32, #tpu.memory_space<vmem>>, vector<1x32xf32>
    %5 = vector.broadcast %4 : vector<1x32xf32> to vector<8x32xf32>
    %6 = arith.addf %3, %5 : vector<8x32xf32>
    %7 = arith.truncf %6 : vector<8x32xf32> to vector<8x32xbf16>
    %c0_6 = arith.constant 0 : index
    %c0_7 = arith.constant 0 : index
    %c0_8 = arith.constant 0 : index
    %8 = vector.load %arg11[%c0_6, %c0_7, %c0_8] : memref<1x8x32xbf16, #tpu.memory_space<vmem>>, vector<1x8x32xbf16>
    %9 = vector.shape_cast %8 : vector<1x8x32xbf16> to vector<8x32xbf16>
    %10 = vector.shape_cast %7 : vector<8x32xbf16> to vector<1x8x32xbf16>
    tpu.vector_store %arg11[%c0_6, %c0_7, %c0_8], %10 {strides = array<i32>} : memref<1x8x32xbf16, #tpu.memory_space<vmem>>, vector<1x8x32xbf16>,
    %c0_9 = arith.constant 0 : index
    %c0_10 = arith.constant 0 : index
    %c0_11 = arith.constant 0 : index
    %11 = vector.load %arg3[%c0_9, %c0_10, %c0_11] : memref<1x8x32xbf16, #tpu.memory_space<vmem>>, vector<1x8x32xbf16>
    %12 = vector.shape_cast %11 : vector<1x8x32xbf16> to vector<8x32xbf16>
    %c0_12 = arith.constant 0 : index
    %c0_13 = arith.constant 0 : index
    %13 = vector.load %arg6[%c0_12, %c0_13] : memref<32x32xbf16, #tpu.memory_space<vmem>>, vector<32x32xbf16>
    %cst_14 = arith.constant dense<0.000000e+00> : vector<8x32xf32>
    %14 = tpu.matmul %12, %13, %cst_14 {dimension_numbers = #tpu.dot_dimension_numbers<[1], [0], [0], [1], [0, 0, 1, 1], [], []>} : vector<8x32xbf16>, vector<32x32xbf16>, vector<8x32xf32> -> vector<8x32xf32>
    %c0_15 = arith.constant 0 : index
    %c0_16 = arith.constant 0 : index
    %15 = vector.load %arg9[%c0_15, %c0_16] : memref<1x32xf32, #tpu.memory_space<vmem>>, vector<1x32xf32>
    %16 = vector.broadcast %15 : vector<1x32xf32> to vector<8x32xf32>
    %17 = arith.addf %14, %16 : vector<8x32xf32>
    %18 = arith.truncf %17 : vector<8x32xf32> to vector<8x32xbf16>
    %c0_17 = arith.constant 0 : index
    %c0_18 = arith.constant 0 : index
    %c0_19 = arith.constant 0 : index
    %19 = vector.load %arg12[%c0_17, %c0_18, %c0_19] : memref<1x8x32xbf16, #tpu.memory_space<vmem>>, vector<1x8x32xbf16>
    %20 = vector.shape_cast %19 : vector<1x8x32xbf16> to vector<8x32xbf16>
    %21 = vector.shape_cast %18 : vector<8x32xbf16> to vector<1x8x32xbf16>
    tpu.vector_store %arg12[%c0_17, %c0_18, %c0_19], %21 {strides = array<i32>} : memref<1x8x32xbf16, #tpu.memory_space<vmem>>, vector<1x8x32xbf16>,
    %c0_20 = arith.constant 0 : index
    %c0_21 = arith.constant 0 : index
    %c0_22 = arith.constant 0 : index
    %22 = vector.load %arg4[%c0_20, %c0_21, %c0_22] : memref<1x8x32xbf16, #tpu.memory_space<vmem>>, vector<1x8x32xbf16>
    %23 = vector.shape_cast %22 : vector<1x8x32xbf16> to vector<8x32xbf16>
    %c0_23 = arith.constant 0 : index
    %c0_24 = arith.constant 0 : index
    %24 = vector.load %arg7[%c0_23, %c0_24] : memref<32x32xbf16, #tpu.memory_space<vmem>>, vector<32x32xbf16>
    %cst_25 = arith.constant dense<0.000000e+00> : vector<8x32xf32>
    %25 = tpu.matmul %23, %24, %cst_25 {dimension_numbers = #tpu.dot_dimension_numbers<[1], [0], [0], [1], [0, 0, 1, 1], [], []>} : vector<8x32xbf16>, vector<32x32xbf16>, vector<8x32xf32> -> vector<8x32xf32>
    %c0_26 = arith.constant 0 : index
    %c0_27 = arith.constant 0 : index
    %26 = vector.load %arg10[%c0_26, %c0_27] : memref<1x32xf32, #tpu.memory_space<vmem>>, vector<1x32xf32>
    %27 = vector.broadcast %26 : vector<1x32xf32> to vector<8x32xf32>
    %28 = arith.addf %25, %27 : vector<8x32xf32>
    %29 = arith.truncf %28 : vector<8x32xf32> to vector<8x32xbf16>
    %c0_28 = arith.constant 0 : index
    %c0_29 = arith.constant 0 : index
    %c0_30 = arith.constant 0 : index
    %30 = vector.load %arg13[%c0_28, %c0_29, %c0_30] : memref<1x8x32xbf16, #tpu.memory_space<vmem>>, vector<1x8x32xbf16>
    %31 = vector.shape_cast %30 : vector<1x8x32xbf16> to vector<8x32xbf16>
    %32 = vector.shape_cast %29 : vector<8x32xbf16> to vector<1x8x32xbf16>
    tpu.vector_store %arg13[%c0_28, %c0_29, %c0_30], %32 {strides = array<i32>} : memref<1x8x32xbf16, #tpu.memory_space<vmem>>, vector<1x8x32xbf16>,
    return
  }
  func.func @transform_0(%arg0: i32, %arg1: i32) -> (i32, i32, i32) {
    %c0_i32 = arith.constant 0 : i32
    %c0_i32_0 = arith.constant 0 : i32
    return %arg0, %arg1, %c0_i32 : i32, i32, i32
  }
  func.func @transform_1(%arg0: i32, %arg1: i32) -> (i32, i32, i32) {
    %c0_i32 = arith.constant 0 : i32
    %c0_i32_0 = arith.constant 0 : i32
    return %arg0, %arg1, %c0_i32 : i32, i32, i32
  }
  func.func @transform_2(%arg0: i32, %arg1: i32) -> (i32, i32, i32) {
    %c0_i32 = arith.constant 0 : i32
    %c0_i32_0 = arith.constant 0 : i32
    return %arg0, %arg1, %c0_i32 : i32, i32, i32
  }
  func.func @transform_3(%arg0: i32, %arg1: i32) -> (i32, i32) {
    %c0_i32 = arith.constant 0 : i32
    %c0_i32_0 = arith.constant 0 : i32
    %c0_i32_1 = arith.constant 0 : i32
    return %c0_i32, %c0_i32_0 : i32, i32
  }
  func.func @transform_4(%arg0: i32, %arg1: i32) -> (i32, i32) {
    %c0_i32 = arith.constant 0 : i32
    %c0_i32_0 = arith.constant 0 : i32
    %c0_i32_1 = arith.constant 0 : i32
    return %c0_i32, %c0_i32_0 : i32, i32
  }
  func.func @transform_5(%arg0: i32, %arg1: i32) -> (i32, i32) {
    %c0_i32 = arith.constant 0 : i32
    %c0_i32_0 = arith.constant 0 : i32
    %c0_i32_1 = arith.constant 0 : i32
    return %c0_i32, %c0_i32_0 : i32, i32
  }
  func.func @transform_6(%arg0: i32, %arg1: i32) -> (i32, i32) {
    %c0_i32 = arith.constant 0 : i32
    %c0_i32_0 = arith.constant 0 : i32
    %c0_i32_1 = arith.constant 0 : i32
    return %c0_i32, %c0_i32_0 : i32, i32
  }
  func.func @transform_7(%arg0: i32, %arg1: i32) -> (i32, i32) {
    %c0_i32 = arith.constant 0 : i32
    %c0_i32_0 = arith.constant 0 : i32
    %c0_i32_1 = arith.constant 0 : i32
    return %c0_i32, %c0_i32_0 : i32, i32
  }
  func.func @transform_8(%arg0: i32, %arg1: i32) -> (i32, i32) {
    %c0_i32 = arith.constant 0 : i32
    %c0_i32_0 = arith.constant 0 : i32
    %c0_i32_1 = arith.constant 0 : i32
    return %c0_i32, %c0_i32_0 : i32, i32
  }
  func.func @transform_9(%arg0: i32, %arg1: i32) -> (i32, i32, i32) {
    %c0_i32 = arith.constant 0 : i32
    %c0_i32_0 = arith.constant 0 : i32
    return %arg0, %arg1, %c0_i32 : i32, i32, i32
  }
  func.func @transform_10(%arg0: i32, %arg1: i32) -> (i32, i32, i32) {
    %c0_i32 = arith.constant 0 : i32
    %c0_i32_0 = arith.constant 0 : i32
    return %arg0, %arg1, %c0_i32 : i32, i32, i32
  }
  func.func @transform_11(%arg0: i32, %arg1: i32) -> (i32, i32, i32) {
    %c0_i32 = arith.constant 0 : i32
    %c0_i32_0 = arith.constant 0 : i32
    return %arg0, %arg1, %c0_i32 : i32, i32, i32
  }
}

</mosaic_0001>

<bundles_post_ra>
// kernel: tpu_custom_call.1
= control target key start
LH: loop header
LB: loop body
LE: loop exit
PB: predicated region body
PF: predicated region fallthrough
CT: control target
= control target key end

     0   :  { %s1857_s0 = inlined_call_operand.hbm [shape: bf16[2,8,32], index: 0, kind: input, shape index: {}]   ;;  %s1858_s1 = inlined_call_operand.hbm [shape: bf16[2,8,32], index: 1, kind: input, shape index: {}]   ;;  %s1859_s2 = inlined_call_operand.hbm [shape: bf16[2,8,32], index: 2, kind: input, shape index: {}]   ;;  %s1860_s3 = inlined_call_operand.hbm [shape: bf16[32,32], index: 3, kind: input, shape index: {}]   ;;  %s1861_s4 = inlined_call_operand.hbm [shape: bf16[32,32], index: 4, kind: input, shape index: {}]   ;;  %s1862_s5 = inlined_call_operand.hbm [shape: bf16[32,32], index: 5, kind: input, shape index: {}]   ;;  %s1863_s6 = inlined_call_operand.vmem [shape: f32[1,32], index: 6, kind: input, shape index: {}]   ;;  %s1864_s7 = inlined_call_operand.vmem [shape: f32[1,32], index: 7, kind: input, shape index: {}]   ;;  %s1865_s8 = inlined_call_operand.vmem [shape: f32[1,32], index: 8, kind: input, shape index: {}]   ;;  %s1866_s9 = inlined_call_operand.hbm [shape: bf16[2,8,32], index: 9, kind: output, shape index: {0}]   ;;  %s1867_s10 = inlined_call_operand.hbm [shape: bf16[2,8,32], index: 10, kind: output, shape index: {1}]   ;;  %s1868_s11 = inlined_call_operand.hbm [shape: bf16[2,8,32], index: 11, kind: output, shape index: {2}]  }
   0x1   :  { %1886 = sst [smem:[#allocation30_spill]] %s1858_s1 }
   0x2   :  { %1887 = sst [smem:[#allocation31_spill]] %s1860_s3 }
   0x3   :  { %1888 = sst [smem:[#allocation32_spill]] %s1861_s4 }
   0x4   :  { %1889 = sst [smem:[#allocation33_spill]] %s1862_s5 }
   0x5   :  { %1890 = sst [smem:[#allocation34_spill]] %s1865_s8 }
   0x6   :  { %1891 = sst [smem:[#allocation35_spill]] %s1866_s9 }
   0x7   :  { %1892 = sst [smem:[#allocation36_spill]] %s1867_s10 }
   0x8   :  { %1893 = sst [smem:[#allocation37_spill]] %s1868_s11 }
   0x9   :  { %17 = vsyncpa [#allocation3], 0 }
   0xa   :  { %19 = vsyncpa [#allocation3 + $0x1], 0 }
   0xb   :  { %20 = vsyncpa [#allocation6], 0 }
   0xc   :  { %22 = vsyncpa [#allocation6 + $0x1], 0 }
   0xd   :  { %23 = vsyncpa [#allocation9], 0 }
   0xe   :  { %24 = vsyncpa [#allocation12], 0 }
   0xf   :  { %25 = vsyncpa [#allocation4], 0 }
  0x10   :  { %27 = vsyncpa [#allocation4 + $0x1], 0 }
  0x11   :  { %28 = vsyncpa [#allocation15], 0 }
  0x12   :  { %30 = vsyncpa [#allocation15 + $0x1], 0  ;;  %s1553_s17 = smov 0   ;;  %s1555_s18 = smov 0  }
  0x13   :  { %s1557_s19 = smov 0   ;;  %s1559_s20 = smov 0  }
  0x14   :  { %s1561_s21 = smov 0   ;;  %s1563_s22 = smov 0  }
  0x15 LB: > { %1894 = sst [smem:[#allocation23_spill]] %s1466_s17  ;;  %s1584_s23 = sadd.s32 4294967295, %s1486_s22   ;;  %s1486_s22 = sphi %s1563_s22, %s36_s22   ;;  %s1482_s21 = sphi %s1561_s21, %s1931_s21   ;;  %s1478_s20 = sphi %s1559_s20, %s1926_s20   ;;  %s1474_s19 = sphi %s1557_s19, %s1930_s19   ;;  %s1470_s18 = sphi %s1555_s18, %s1929_s18   ;;  %s1466_s17 = sphi %s1553_s17, %s1928_s17  }
  0x16   : > { %1895 = sst [smem:[#allocation24_spill]] %s1482_s21  ;;  %p972_p0 = scmp.ge.s32.totalorder %s1486_s22, 1 }
  0x17   : > { %1896 = sst [smem:[#allocation25_spill]] %s1486_s22  ;;  %p71_p1 = scmp.eq.s32.totalorder %s1584_s23, 0 }
  0x18   : > { %p347_p2 = scmp.lt.s32.totalorder %s1486_s22, 3  ;;  %s1897_s3 = sld [smem:[#allocation31_spill]] }
  0x19   : > { %s1488_s28 = smov [#allocation8]   ;;  %p976_p6 = scmp.ge.s32.totalorder %s1486_s22, 2 }
  0x1a   : > { %p1592_p3 = pnand %p972_p0, %p347_p2  ;;  %s360_s29 = sshll.u32 %s1488_s28, 4  ;;  %s361_s29 = int_to_ptr.vmem [resolvable:$true] %s360_s29 }
  0x1b   : > { %s1869_s12 = smov 64   ;;  %s1871_s13 = smov 4  }
  0x1c   : > { %p1058_p4 = pneg %p1592_p3  ;;  %s1874_s14 = sadd.s32 4294967294, %s1486_s22  }
  0x1d   : > { %s48_s15 = sadd.s32 1, %s1482_s21  ;;  %s57_s16 = sadd.s32 1, %s1474_s19 }
  0x1e   : > { %s358_s26 = sshll.u32 %s1897_s3, 4  ;;  %p1600_p5 = pnand %p1058_p4, %p71_p1  ;;  %s359_s26 = int_to_ptr.hbm [resolvable:$true] %s358_s26 }
  0x1f   : > { %p50_p7 = scmp.ge.s32.totalorder %s48_s15, 2  ;;  %p64_p8 = scmp.ne.s32.totalorder %s1474_s19, %s1470_s18 }
  0x20   : > { %1061 = dma.hbm_to_vmem [thread:$0]  (!%p1600_p5), %s359_s26, 256, %s361_s29, [#allocation9], %s1869_s12, %s1869_s12, %s1871_s13  }
  0x21   : > { %p65_p9 = scmp.eq.s32.totalorder %s1486_s22, 0  ;;  %p70_p10 = scmp.ne.s32.totalorder %s1470_s18, %s1466_s17 }
  0x22   : > { %s1933_s15 = smov (%p50_p7, %s48_s15), 0  ;;  %p278_p13 = scmp.eq.s32.totalorder %s1584_s23, 1 }
  0x23   : > { %1900 = sst [smem:[#allocation26_spill]] %s1933_s15  ;;  %p1620_p11 = por %p65_p9, %p64_p8 }
  0x24   : > { %p1626_p12 = por %p71_p1, %p70_p10  ;;  %s52_s26 = ssub.s32 %s1482_s21, %s1933_s15 }
  0x25   : > { %p55_p0 = scmp.eq.s32.totalorder %s52_s26, 0  ;;  %p284_p2 = scmp.eq.s32.totalorder %s1874_s14, 1 }
  0x26   : > { %p1635_p4 = por %p278_p13, %p64_p8  ;;  %p1091_p7 = scmp.lt.s32.totalorder %s1486_s22, 2 }
  0x27   : > { %s1641_s29 = scalar_select %p55_p0, %s1474_s19, %s57_s16  }
  0x28   : > { %s1903_s28 = scalar_select %p1635_p4, 1, 0 }
  0x29   : > { %1905 = sst [smem:[#allocation28_spill]] %s1641_s29  ;;  %p1643_p9 = por %p284_p2, %p70_p10 }
  0x2a   : > { %1904 = sst [smem:[#allocation27_spill]] %s1903_s28  ;;  %s1877_s13 = sand.u32 1, %s1474_s19  }
  0x2b   : > { %s1906_s12 = scalar_select %p1643_p9, 1, 0 }
  0x2c   : > { %s1650_s3 = sshll.u32 %s1877_s13, 2  ;;  %s1653_s15 = sshll.u32 %s1482_s21, 2 }
  0x2d   : > { %1907 = sst [smem:[#allocation29_spill]] %s1906_s12  ;;  %p1657_p8 = pnand %p1091_p7, %p1620_p11 }
  0x2e   : > { %s431_s16 = sand.u32 1, %s1486_s22   ;;  %s1909_s1 = sld [smem:[#allocation30_spill]] }
  0x2f   : > { %s435_s8 = scalar_lea.vmem [#allocation5], %s1650_s3  ;;  %s1667_s24 = scalar_lea.sflag [#allocation6], %s431_s16 }
  0x30   : > { %s444_s13 = sshll.u32 %s435_s8, 4  ;;  %s1910_s4 = sld [smem:[#allocation32_spill]]  ;;  %s445_s13 = int_to_ptr.vmem [resolvable:$true] %s444_s13 }
  0x31   : > { %s1491_s14 = smov [#allocation10]   ;;  %s1911_s5 = sld [smem:[#allocation33_spill]] }
  0x32   : > { %s1912_s16 = smov 4   ;;  %s1913_s11 = smov 64  }
  0x33   : > { %s415_s8 = scalar_lea.vmem [#allocation2], %s1650_s3  ;;  %s455_s9 = scalar_lea.vmem [#allocation7], %s1650_s3 }
  0x34   : > { %s440_s12 = scalar_lea.hbm %s1909_s1, %s1653_s15  ;;  %s424_s29 = sshll.u32 %s415_s8, 4  ;;  %s425_s29 = int_to_ptr.vmem [resolvable:$true] %s424_s29 }
  0x35   : > { %s442_s17 = sshll.u32 %s440_s12, 4  ;;  %s374_s12 = sshll.u32 %s1491_s14, 4  ;;  %s443_s17 = int_to_ptr.hbm [resolvable:$true] %s442_s17  ;;  %s375_s12 = int_to_ptr.vmem [resolvable:$true] %s374_s12 }
  0x36   : > { %1074 = dma.hbm_to_vmem [thread:$0]  (!%p1657_p8), %s443_s17, 64, %s445_s13, %s1667_s24  }
  0x37   : > { %s372_s22 = sshll.u32 %s1910_s4, 4  ;;  %s386_s1 = sshll.u32 %s1911_s5, 4  ;;  %s373_s22 = int_to_ptr.hbm [resolvable:$true] %s372_s22  ;;  %s387_s1 = int_to_ptr.hbm [resolvable:$true] %s386_s1 }
  0x38   : > { %1064 = dma.hbm_to_vmem [thread:$0]  (!%p1600_p5), %s373_s22, 256, %s375_s12, [#allocation9], %s1913_s11, %s1913_s11, %s1912_s16  }
  0x39   : > { %s1492_s17 = smov [#allocation11]   ;;  %s420_s14 = scalar_lea.hbm %s1857_s0, %s1653_s15 }
  0x3a   : > { %s388_s21 = sshll.u32 %s1492_s17, 4  ;;  %s422_s4 = sshll.u32 %s420_s14, 4  ;;  %s389_s21 = int_to_ptr.vmem [resolvable:$true] %s388_s21  ;;  %s423_s4 = int_to_ptr.hbm [resolvable:$true] %s422_s4 }
  0x3b   : > { %1067 = dma.hbm_to_vmem [thread:$0]  (!%p1600_p5), %s387_s1, 256, %s389_s21, [#allocation12], %s1913_s11, %s1913_s11, %s1912_s16  }
  0x3c   : > { %s1914_s22 = sand.u32 1, %s1474_s19   ;;  %s460_s5 = scalar_lea.hbm %s1859_s2, %s1653_s15 }
  0x3d   : > { %s412_s12 = scalar_lea.sflag [#allocation3], %s1914_s22  ;;  %s464_s10 = sshll.u32 %s455_s9, 4  ;;  %s465_s10 = int_to_ptr.vmem [resolvable:$true] %s464_s10 }
  0x3e   : > { %1071 = dma.hbm_to_vmem [thread:$0]  (!%p1657_p8), %s423_s4, 64, %s425_s29, %s412_s12  }
  0x3f   : > { %s462_s1 = sshll.u32 %s460_s5, 4  ;;  %473 = sbr.rel (%p1592_p3) target bundleno = 247 (0xf7), region = 56  ;;  %s463_s1 = int_to_ptr.hbm [resolvable:$true] %s462_s1 }
  0x40   : > { %1077 = dma.hbm_to_vmem [thread:$0]  (!%p1657_p8), %s463_s1, 64, %s465_s10, %s1667_s24  }
  0x41   : > { %s1708_s11 = sand.u32 (!%p1592_p3), 1, %s1470_s18  }
  0x42   : > { %s1711_s4 = sshll.u32 (!%p1592_p3), %s1708_s11, 2  ;;  %s476_s15 = scalar_lea.sflag (!%p1592_p3), [#allocation3], %s1708_s11 }
  0x43   : > { %s479_s3 = scalar_lea.vmem (!%p1592_p3), [#allocation2], %s1711_s4 }
  0x44   : > { %1441 = dma.done.wait (%p1626_p12), %s476_s15, 64  }
  0x45   : > { %1443 = vsyncadd (%p1626_p12), %s476_s15, 4294967232  ;;  %s485_s5 = sand.u32 1, %s1584_s23   ;;  %s489_s10 = scalar_lea.vmem [#allocation5], %s1711_s4 }
  0x46   : > { %s486_s9 = scalar_lea.sflag [#allocation6], %s485_s5 }
  0x47   : > { %1445 = dma.done.wait (%p1626_p12), %s486_s9, 128  }
  0x48   : > { %1447 = vsyncadd (%p1626_p12), %s486_s9, 4294967168  ;;  %s499_s27 = scalar_lea.vmem [#allocation7], %s1711_s4 }
  0x49   : > { %1449 = dma.done.wait (%p71_p1), [#allocation9], 512  }
  0x4a   : > { %1451 = vsyncadd (%p71_p1), [#allocation9], 4294966784 }
  0x4b   : > { %1453 = dma.done.wait (%p71_p1), [#allocation12], 256  }
  0x4c   : > { %1455 = vsyncadd (%p71_p1), [#allocation12], 4294967040  ;;  %v1029_v0 = vld [vmem:[#allocation8 + $0x8] sm:$0xff]  ;;  %v1031_v1 = vld [vmem:[#allocation10 + $0x8] sm:$0xff]  ;;  %vm596_vm0 = vcmask 261120   ;;  %s1023_s25 = sshll.u32 %s1478_s20, 2 }
  0x4d   : > { %v1033_v2 = vld [vmem:[#allocation11 + $0x8] sm:$0xff]  ;;  %606 = vmatpush.bf16.msra.mxu0 %v1029_v0  ;;  %646 = vmatpush.bf16.msra.mxu1 %v1031_v1  ;;  %v1028_v3 = vld [vmem:[#allocation8] sm:$0xff]  ;;  %v1030_v4 = vld [vmem:[#allocation10] sm:$0xff]  ;;  %s1915_s14 = sld [smem:[#allocation36_spill]]  ;;  %s566_s29 = scalar_lea.vmem [#allocation14], %s1711_s4  ;;  %vm614_vm1 = vcmask 257024  }
  0x4e   : > { %685 = vmatpush.bf16.msra.mxu2 %v1033_v2  ;;  %v1032_v5 = vld [vmem:[#allocation11] sm:$0xff]  ;;  %v575_v6 = vld [vmem:[%s479_s3] sm:$0xf]  ;;  %v616_v7 = vld [vmem:[%s489_s10] sm:$0xf]  ;;  %s1747_s22 = sshll.u32 %s566_s29, 4  ;;  %s734_s22 = int_to_ptr.vmem [resolvable:$true] %s1747_s22 }
  0x4f   : > { %v655_v8 = vld [vmem:[%s499_s27] sm:$0xf]  ;;  %v1149_v9 = vld [vmem:[%s1863_s6] ss:$0 sm:$0xff]  ;;  %s1916_s17 = sld [smem:[#allocation35_spill]]  ;;  %s559_s3 = scalar_lea.vmem [#allocation13], %s1711_s4 }
  0x50   : > { %v1150_v10 = vld [vmem:[%s1864_s7] ss:$0 sm:$0xff]  ;;  %s1758_s9 = sshll.u32 %s559_s3, 4  ;;  %s1918_s24 = sld [smem:[#allocation37_spill]]  ;;  %s719_s9 = int_to_ptr.vmem [resolvable:$true] %s1758_s9 }
  0x51   : > { %607 = vmatpush.bf16.msra.mxu0 %v1028_v3  ;;  %647 = vmatpush.bf16.msra.mxu1 %v1030_v4  ;;  %s573_s12 = scalar_lea.vmem [#allocation16], %s1711_s4 }
  0x52   : > { %686 = vmatpush.bf16.msra.mxu2 %v1032_v5  ;;  %s1775_s30 = sshll.u32 %s573_s12, 4  ;;  %s749_s30 = int_to_ptr.vmem [resolvable:$true] %s1775_s30 }
  0x53   : > { %s731_s8 = scalar_lea.hbm %s1915_s14, %s1023_s25 }
  0x54   : > { %1001 = vmatmul.msk.bf16.vlgmr.msra.gmra.mxu0 %vm596_vm0, %v575_v6  ;;  %1010 = vmatmul.msk.bf16.vlgmr.msra.gmra.mxu1 %vm596_vm0, %v616_v7  ;;  %s1753_s15 = sshll.u32 %s731_s8, 4  ;;  %s1920_s8 = sld [smem:[#allocation34_spill]]  ;;  %s736_s15 = int_to_ptr.hbm [resolvable:$true] %s1753_s15 }
  0x55   : > { %1019 = vmatmul.msk.bf16.vlgmr.msra.gmra.mxu2 %vm596_vm0, %v655_v8  ;;  %s1917_s1 = smov %s1916_s17  ;;  %s716_s20 = scalar_lea.hbm %s1916_s17, %s1023_s25 }
  0x56   : > { %s1760_s10 = sshll.u32 %s716_s20, 4  ;;  %s746_s16 = scalar_lea.hbm %s1918_s24, %s1023_s25  ;;  %s721_s10 = int_to_ptr.hbm [resolvable:$true] %s1760_s10 }
  0x57   : > { %s1777_s17 = sshll.u32 %s746_s16, 4  ;;  %s1781_s25 = scalar_lea.sflag [#allocation15], %s485_s5  ;;  %s751_s17 = int_to_ptr.hbm [resolvable:$true] %s1777_s17 }
  0x58   : > { %s1346_s20 = sshra.s32 %s736_s15, 4  ;;  %s1347_s20 = int_to_ptr.hbm [resolvable:$true] %s1346_s20 }
  0x59   : > { %s1348_s27 = scalar_lea.hbm %s1347_s20, 4  ;;  %p1353_p10 = scmp.lt.s32.totalorder %s1347_s20, %s1915_s14 }
  0x5a   : > { %v1151_v17 = vld [vmem:[%s1920_s8] ss:$0 sm:$0xff]  ;;  %p1349_p1 = scmp.ne.s32.totalorder %s1347_s20, %s1348_s27 }
  0x5c   : > { %p1350_p3 = pnand %p1349_p1, %p1635_p4 }
  0x5e   : > { %p1351_p5 = pneg %p1350_p3 }
  0xd1   : > { %v609_v11 = vpop.f32.mrf.mxu0  ;;  %v649_v12 = vpop.f32.mrf.mxu1 }
  0xd2   : > { %v610_v13 = vadd.f32 %v1149_v9, %v609_v11  ;;  %v650_v14 = vadd.f32 %v1150_v10, %v649_v12 }
  0xd4   : > { %v613_v15 = vpack.c.bf16 %v610_v13, %v610_v13  ;;  %v653_v16 = vpack.c.bf16 %v650_v14, %v650_v14 }
  0xd6   : > { %654 = vst.msk [vmem:[%s566_s29] sm:$0xf] %vm614_vm1, %v653_v16  ;;  %s1352_s29 = scalar_lea.hbm %s1915_s14, 8 }
  0xd7   : > { %p1354_p11 = scmp.lt.s32.totalorder %s1352_s29, %s1348_s27 }
  0xd9   : > { %p1355_p12 = por %p1354_p11, %p1353_p10 }
  0xdb   : > { %p1356_p13 = pnand %p1355_p12, %p1351_p5 }
  0xdd   : > { %1359 = shalt.err (!%p1356_p13)
}
  0xde   : > { %1053 = dma.vmem_to_hbm [thread:$0]  (%p1635_p4), %s734_s22, 64, %s736_s15, %s1781_s25   ;;  %615 = vst.msk [vmem:[%s559_s3] sm:$0xf] %vm614_vm1, %v613_v15  ;;  %v688_v18 = vpop.f32.mrf.mxu2 }
  0xdf   : > { %s695_s23 = scalar_lea.sflag [#allocation4], %s1708_s11  ;;  %s1374_s5 = sshra.s32 %s721_s10, 4  ;;  %s1375_s5 = int_to_ptr.hbm [resolvable:$true] %s1374_s5 }
  0xe0   : > { %s1376_s16 = scalar_lea.hbm %s1375_s5, 4  ;;  %s1380_s26 = scalar_lea.hbm %s1917_s1, 8 }
  0xe1   : > { %p1377_p0 = scmp.ne.s32.totalorder %s1375_s5, %s1376_s16  ;;  %p1381_p8 = scmp.lt.s32.totalorder %s1375_s5, %s1917_s1 }
  0xe2   : > { %p1382_p1 = scmp.lt.s32.totalorder %s1380_s26, %s1376_s16 }
  0xe3   : > { %p1378_p2 = pnand %p1377_p0, %p1635_p4 }
  0xe4   : > { %p1383_p3 = por %p1382_p1, %p1381_p8 }
  0xe5   : > { %p1379_p7 = pneg %p1378_p2 }
  0xe7   : > { %p1384_p5 = pnand %p1383_p3, %p1379_p7 }
  0xe9   : > { %1387 = shalt.err (!%p1384_p5)
}
  0xea   : > { %1052 = dma.vmem_to_hbm [thread:$0]  (%p1635_p4), %s719_s9, 64, %s721_s10, %s695_s23   ;;  %v689_v19 = vadd.f32 %v1151_v17, %v688_v18  ;;  %v611_v20 = vpop.f32.mrf.mxu0  ;;  %v651_v21 = vpop.f32.mrf.mxu1 }
  0xeb   : > { %s1402_s11 = sshra.s32 %s751_s17, 4  ;;  %s1408_s9 = scalar_lea.hbm %s1918_s24, 8  ;;  %s1403_s11 = int_to_ptr.hbm [resolvable:$true] %s1402_s11 }
  0xec   : > { %v692_v22 = vpack.c.bf16 %v689_v19, %v689_v19  ;;  %s1404_s22 = scalar_lea.hbm %s1403_s11, 4  ;;  %p1409_p13 = scmp.lt.s32.totalorder %s1403_s11, %s1918_s24 }
  0xed   : > { %p1405_p10 = scmp.ne.s32.totalorder %s1403_s11, %s1404_s22  ;;  %p1410_p0 = scmp.lt.s32.totalorder %s1408_s9, %s1404_s22 }
  0xee   : > { %693 = vst.msk [vmem:[%s573_s12] sm:$0xf] %vm614_vm1, %v692_v22 }
  0xef   : > { %p1406_p11 = pnand %p1405_p10, %p1635_p4  ;;  %p1411_p2 = por %p1410_p0, %p1409_p13 }
  0xf1   : > { %p1407_p12 = pneg %p1406_p11 }
  0xf3   : > { %p1412_p7 = pnand %p1411_p2, %p1407_p12 }
  0xf5   : > { %1415 = shalt.err (!%p1412_p7)
}
  0xf6   : > { %1054 = dma.vmem_to_hbm [thread:$0]  (%p1635_p4), %s749_s30, 64, %s751_s17, %s1781_s25   ;;  %v690_v23 = vpop.f32.mrf.mxu2 }
  0xf7 PF: > { %s1921_s4 = sld [smem:[#allocation23_spill]]  ;;  %p1079_p8 = pnand %p976_p6, %p1643_p9 }
  0xf8   : > { %s1923_s8 = sld [smem:[#allocation25_spill]] }
  0xf9   : > { %p1080_p1 = pneg %p1079_p8 }
  0xfd   : > { %s762_s23 = sand.u32 1, %s1921_s4  }
  0xfe   : > { %s763_s5 = scalar_lea.sflag [#allocation4], %s762_s23 }
  0xff   : > { %1457 = dma.done.wait (%p1080_p1), %s763_s5, 64  }
 0x100   : > { %1459 = vsyncadd (%p1080_p1), %s763_s5, 4294967232  ;;  %s1924_s16 = sadd.s32 4294967294, %s1923_s8  }
 0x101   : > { %s772_s20 = sand.u32 1, %s1924_s16  }
 0x102   : > { %s773_s27 = scalar_lea.sflag [#allocation15], %s772_s20 }
 0x103   : > { %1461 = dma.done.wait (%p1080_p1), %s773_s27, 128  }
 0x104   : > { %1463 = vsyncadd (%p1080_p1), %s773_s27, 4294967168  ;;  %s36_s22 = sadd.s32 1, %s1923_s8   ;;  %s1925_s21 = sld [smem:[#allocation28_spill]] }
 0x105   : > { %p33_p4 = scmp.ge.s32.totalorder %s36_s22, 4   ;;  %s1926_s20 = sld [smem:[#allocation24_spill]] }
 0x106   : > { %s1927_s30 = sld [smem:[#allocation26_spill]]  ;;  %s1928_s17 = smov %s1470_s18 }
 0x107   : > { %s1929_s18 = smov %s1474_s19 }
 0x108   :  { %35 = sbr.rel (!%p33_p4) target bundleno = 21 (0x15), region = 169 }
 0x10a   : > { %s1930_s19 = smov %s1925_s21 }
 0x10c   : > { %s1931_s21 = smov %s1927_s30 }
 0x10d   :  { %789 = vsyncpa [#allocation3], 1 }
 0x10e   :  { %791 = vsyncpa [#allocation3 + $0x1], 1 }
 0x10f   :  { %792 = vsyncpa [#allocation6], 1 }
 0x110   :  { %794 = vsyncpa [#allocation6 + $0x1], 1 }
 0x111   :  { %795 = vsyncpa [#allocation9], 1 }
 0x112   :  { %796 = vsyncpa [#allocation12], 1 }
 0x113   :  { %797 = vsyncpa [#allocation4], 1 }
 0x114   :  { %799 = vsyncpa [#allocation4 + $0x1], 1 }
 0x115   :  { %800 = vsyncpa [#allocation15], 1 }
 0x116   :  { %802 = vsyncpa [#allocation15 + $0x1], 1 }

</bundles_post_ra>
